<compile_context>
chip_gen: v7x
topology: tpu7x:2x2x1
jax: 0.10.0
libtpu: 0.0.40
codegen_flags: <defaults>
</compile_context>

<pallas_src>
import jax
import jax.numpy as jnp
from jax.experimental import pallas as pl
from jax.experimental.pallas import tpu as pltpu

NUM_FEATURES = 1000
NUM_ROOT = 168
NUM_VOWEL = 11
NUM_CONSONANT = 7

NUM_HEADS_OUT = NUM_ROOT + NUM_VOWEL + NUM_CONSONANT   # 186
NUM_FEATURES_PAD = 1024      # K padded to a multiple of 256 (MXU depth)
NUM_HEADS_PAD = 256          # N padded -> unmasked, lane-dense stores
SUBLANE = 8


# ---------------------------------------------------------------------------
# Fused kernel: GAP -> (stand-in) feature projection -> packed 3-head linear
# ---------------------------------------------------------------------------
def _fused_kernel(x_ref, wf_ref, bf_ref, wh_ref, bh_ref, out_ref):
    # x_ref  : [C, Bp, HW]   f32  (channel-major: each x_ref[c] is a dense
    #                              [Bp, HW] tile, no masked sublanes)
    # wf_ref : [C, 1024]     f32  (cols 1000:1024 zero) -- VPU path stays f32
    # bf_ref : [1, 1024]     f32  (cols 1000:1024 zero)
    # wh_ref : [1024, 256]   bf16 (concat(root, vowel, cons); pads zero)
    # bh_ref : [1, 256]      f32
    # out_ref: [Bp, 256]     f32  (lane-dense -> unmasked vst)
    C = x_ref.shape[0]
    wf = wf_ref[...]                                           # [C, 1024] f32

    # Per-channel global average pool (XLU lane reduce on a dense tile) fused
    # with the degenerate K=C(=3) projection as VPU broadcast FMAs in f32
    # (v5e has no bf16 VALUs; only the MXU operands below go bf16).
    pooled0 = jnp.mean(x_ref[0], axis=-1, keepdims=True)       # [Bp, 1]
    feat = pooled0 * wf[0:1, :]                                # [Bp, 1024]
    for c in range(1, C):                                      # unrolled (static C)
        pooled_c = jnp.mean(x_ref[c], axis=-1, keepdims=True)
        feat = feat + pooled_c * wf[c:c + 1, :]
    feat = feat + bf_ref[...]                                  # + backbone bias (f32)

    # Single MXU pass over the packed bf16 head slab, f32 accumulate,
    # one unmasked 256-wide store.
    out_ref[...] = (
        jnp.dot(feat.astype(jnp.bfloat16), wh_ref[...],
                preferred_element_type=jnp.float32)
        + bh_ref[...]
    )


# ---------------------------------------------------------------------------
# Wrapper
# ---------------------------------------------------------------------------
_VMEM = pl.BlockSpec(memory_space=pltpu.MemorySpace.VMEM)


def efficientnet_wrapper_forward(x, packed_params):
    B, C, H, W = x.shape
    Bp = max(SUBLANE, pl.cdiv(B, SUBLANE) * SUBLANE)

    # Channel-major [C, Bp, HW]: dense (Bp, HW) trailing tiles per channel.
    x3 = jnp.transpose(x, (1, 0, 2, 3)).reshape(C, B, H * W).astype(jnp.float32)
    if Bp != B:
        x3 = jnp.pad(x3, ((0, 0), (0, Bp - B), (0, 0)))

    out = pl.pallas_call(
        _fused_kernel,
        out_shape=jax.ShapeDtypeStruct((Bp, NUM_HEADS_PAD), jnp.float32),
        in_specs=[_VMEM] * 5,
        out_specs=_VMEM,
    )(x3,
      packed_params["w_feat_pad"], packed_params["b_feat_pad"],
      packed_params["w_heads"], packed_params["b_heads"])

    out = out[:B]
    out_root = out[:, :NUM_ROOT]
    out_vowel = out[:, NUM_ROOT:NUM_ROOT + NUM_VOWEL]
    out_cons = out[:, NUM_ROOT + NUM_VOWEL:NUM_HEADS_OUT]
    return out_root, out_vowel, out_cons


# ---------------------------------------------------------------------------
# Parameter init (nn.Linear-style uniform(-1/sqrt(in), 1/sqrt(in))) + packing
# ---------------------------------------------------------------------------
def init_params(key, in_channels):
    def linear(key, fan_in, fan_out):
        kw, kb = jax.random.split(key)
        bound = 1.0 / jnp.sqrt(fan_in)
        w = jax.random.uniform(kw, (fan_in, fan_out), jnp.float32, -bound, bound)
        b = jax.random.uniform(kb, (1, fan_out), jnp.float32, -bound, bound)
        return w, b

    k_feat, k_root, k_vowel, k_cons = jax.random.split(key, 4)
    w_feat, b_feat = linear(k_feat, in_channels, NUM_FEATURES)
    w_root, b_root = linear(k_root, NUM_FEATURES, NUM_ROOT)
    w_vowel, b_vowel = linear(k_vowel, NUM_FEATURES, NUM_VOWEL)
    w_cons, b_cons = linear(k_cons, NUM_FEATURES, NUM_CONSONANT)
    return {
        "w_feat": w_feat, "b_feat": b_feat,
        "w_root": w_root, "b_root": b_root,
        "w_vowel": w_vowel, "b_vowel": b_vowel,
        "w_cons": w_cons, "b_cons": b_cons,
    }


def pack_params(p):
    """Zero-pad the backbone projection (f32, VPU path) and pack the three
    heads into one lane-dense [1024, 256] bf16 slab (root | vowel | cons |
    zero pad). Biases stay f32 (added after the f32 accumulate)."""
    kpad = NUM_FEATURES_PAD - NUM_FEATURES          # 24
    npad = NUM_HEADS_PAD - NUM_HEADS_OUT            # 70

    w_feat_pad = jnp.pad(p["w_feat"], ((0, 0), (0, kpad)))
    b_feat_pad = jnp.pad(p["b_feat"], ((0, 0), (0, kpad)))

    w_heads = jnp.concatenate([p["w_root"], p["w_vowel"], p["w_cons"]], axis=1)
    b_heads = jnp.concatenate([p["b_root"], p["b_vowel"], p["b_cons"]], axis=1)
    w_heads = jnp.pad(w_heads, ((0, kpad), (0, npad))).astype(jnp.bfloat16)
    b_heads = jnp.pad(b_heads, ((0, 0), (0, npad)))

    return {
        "w_feat_pad": w_feat_pad, "b_feat_pad": b_feat_pad,
        "w_heads": w_heads, "b_heads": b_heads,
    }


# ---------------------------------------------------------------------------
# Main
# ---------------------------------------------------------------------------
if __name__ == "__main__":
    key = jax.random.PRNGKey(0)
    k_x, k_p = jax.random.split(key)

    B, C, H, W = 2, 3, 16, 16            # in_channels=3 as in the module
    x = jax.random.normal(k_x, (B, C, H, W), jnp.float32)
    params = init_params(k_p, C)
    packed = pack_params(params)

    out_root, out_vowel, out_cons = jax.block_until_ready(
        efficientnet_wrapper_forward(x, packed))

    # Pure-JAX references.
    x3 = x.reshape(B, C, H * W)
    feat_f32 = x3.mean(-1) @ params["w_feat"] + params["b_feat"]

    # (a) full-f32 reference (loose tolerance: kernel uses bf16 MXU operands)
    ref_root_f32 = feat_f32 @ params["w_root"] + params["b_root"]
    ref_vowel_f32 = feat_f32 @ params["w_vowel"] + params["b_vowel"]
    ref_cons_f32 = feat_f32 @ params["w_cons"] + params["b_cons"]

    # (b) reference mimicking the kernel's bf16 casts (tighter tolerance)
    feat_pad = jnp.pad(feat_f32, ((0, 0), (0, NUM_FEATURES_PAD - NUM_FEATURES)))
    out_mimic = (
        jnp.dot(feat_pad.astype(jnp.bfloat16), packed["w_heads"],
                preferred_element_type=jnp.float32)
        + packed["b_heads"]
    )
    ref_root_b = out_mimic[:, :NUM_ROOT]
    ref_vowel_b = out_mimic[:, NUM_ROOT:NUM_ROOT + NUM_VOWEL]
    ref_cons_b = out_mimic[:, NUM_ROOT + NUM_VOWEL:NUM_HEADS_OUT]

    assert out_root.shape == (B, NUM_ROOT)
    assert out_vowel.shape == (B, NUM_VOWEL)
    assert out_cons.shape == (B, NUM_CONSONANT)

    assert jnp.allclose(out_root, ref_root_b, atol=5e-3, rtol=5e-3)
    assert jnp.allclose(out_vowel, ref_vowel_b, atol=5e-3, rtol=5e-3)
    assert jnp.allclose(out_cons, ref_cons_b, atol=5e-3, rtol=5e-3)

    assert jnp.allclose(out_root, ref_root_f32, atol=2e-2, rtol=2e-2)
    assert jnp.allclose(out_vowel, ref_vowel_f32, atol=2e-2, rtol=2e-2)
    assert jnp.allclose(out_cons, ref_cons_f32, atol=2e-2, rtol=2e-2)

    print("KERNEL_OK")
</pallas_src>

<mosaic_0001>
module attributes {stable_mosaic.version = 11 : i64} {
  func.func @_fused_kernel(%arg0: memref<3x8x256xf32, #tpu.memory_space<vmem>>, %arg1: memref<3x1024xf32, #tpu.memory_space<vmem>>, %arg2: memref<1x1024xf32, #tpu.memory_space<vmem>>, %arg3: memref<1024x256xbf16, #tpu.memory_space<vmem>>, %arg4: memref<1x256xf32, #tpu.memory_space<vmem>>, %arg5: memref<8x256xf32, #tpu.memory_space<vmem>>) attributes {dimension_semantics = [], scalar_prefetch = 0 : i64, scratch_operands = 0 : i64, tpu.core_type = #tpu.core_type<tc>} {
    %c0 = arith.constant 0 : index
    %c0_0 = arith.constant 0 : index
    %0 = vector.load %arg1[%c0, %c0_0] : memref<3x1024xf32, #tpu.memory_space<vmem>>, vector<3x1024xf32>
    %c0_1 = arith.constant 0 : index
    %c0_2 = arith.constant 0 : index
    %c0_3 = arith.constant 0 : index
    %1 = vector.load %arg0[%c0_1, %c0_2, %c0_3] : memref<3x8x256xf32, #tpu.memory_space<vmem>>, vector<1x8x256xf32>
    %2 = vector.shape_cast %1 : vector<1x8x256xf32> to vector<8x256xf32>
    %cst = arith.constant dense<0.000000e+00> : vector<8xf32>
    %3 = vector.multi_reduction <add>, %2, %cst [1] : vector<8x256xf32> to vector<8xf32>
    %4 = vector.shape_cast %3 : vector<8xf32> to vector<8x1xf32>
    %cst_4 = arith.constant 2.560000e+02 : f32
    %5 = vector.broadcast %cst_4 : f32 to vector<8x1xf32>
    %6 = arith.divf %4, %5 : vector<8x1xf32>
    %7 = vector.extract_strided_slice %0 {offsets = [0, 0], sizes = [1, 1024], strides = [1, 1]} : vector<3x1024xf32> to vector<1x1024xf32>
    %8 = vector.broadcast %6 : vector<8x1xf32> to vector<8x1024xf32>
    %9 = vector.broadcast %7 : vector<1x1024xf32> to vector<8x1024xf32>
    %10 = arith.mulf %8, %9 : vector<8x1024xf32>
    %c1 = arith.constant 1 : index
    %c0_5 = arith.constant 0 : index
    %c0_6 = arith.constant 0 : index
    %11 = vector.load %arg0[%c1, %c0_5, %c0_6] : memref<3x8x256xf32, #tpu.memory_space<vmem>>, vector<1x8x256xf32>
    %12 = vector.shape_cast %11 : vector<1x8x256xf32> to vector<8x256xf32>
    %cst_7 = arith.constant dense<0.000000e+00> : vector<8xf32>
    %13 = vector.multi_reduction <add>, %12, %cst_7 [1] : vector<8x256xf32> to vector<8xf32>
    %14 = vector.shape_cast %13 : vector<8xf32> to vector<8x1xf32>
    %cst_8 = arith.constant 2.560000e+02 : f32
    %15 = vector.broadcast %cst_8 : f32 to vector<8x1xf32>
    %16 = arith.divf %14, %15 : vector<8x1xf32>
    %17 = vector.extract_strided_slice %0 {offsets = [1, 0], sizes = [1, 1024], strides = [1, 1]} : vector<3x1024xf32> to vector<1x1024xf32>
    %18 = vector.broadcast %16 : vector<8x1xf32> to vector<8x1024xf32>
    %19 = vector.broadcast %17 : vector<1x1024xf32> to vector<8x1024xf32>
    %20 = arith.mulf %18, %19 : vector<8x1024xf32>
    %21 = arith.addf %10, %20 : vector<8x1024xf32>
    %c2 = arith.constant 2 : index
    %c0_9 = arith.constant 0 : index
    %c0_10 = arith.constant 0 : index
    %22 = vector.load %arg0[%c2, %c0_9, %c0_10] : memref<3x8x256xf32, #tpu.memory_space<vmem>>, vector<1x8x256xf32>
    %23 = vector.shape_cast %22 : vector<1x8x256xf32> to vector<8x256xf32>
    %cst_11 = arith.constant dense<0.000000e+00> : vector<8xf32>
    %24 = vector.multi_reduction <add>, %23, %cst_11 [1] : vector<8x256xf32> to vector<8xf32>
    %25 = vector.shape_cast %24 : vector<8xf32> to vector<8x1xf32>
    %cst_12 = arith.constant 2.560000e+02 : f32
    %26 = vector.broadcast %cst_12 : f32 to vector<8x1xf32>
    %27 = arith.divf %25, %26 : vector<8x1xf32>
    %28 = vector.extract_strided_slice %0 {offsets = [2, 0], sizes = [1, 1024], strides = [1, 1]} : vector<3x1024xf32> to vector<1x1024xf32>
    %29 = vector.broadcast %27 : vector<8x1xf32> to vector<8x1024xf32>
    %30 = vector.broadcast %28 : vector<1x1024xf32> to vector<8x1024xf32>
    %31 = arith.mulf %29, %30 : vector<8x1024xf32>
    %32 = arith.addf %21, %31 : vector<8x1024xf32>
    %c0_13 = arith.constant 0 : index
    %c0_14 = arith.constant 0 : index
    %33 = vector.load %arg2[%c0_13, %c0_14] : memref<1x1024xf32, #tpu.memory_space<vmem>>, vector<1x1024xf32>
    %34 = vector.broadcast %33 : vector<1x1024xf32> to vector<8x1024xf32>
    %35 = arith.addf %32, %34 : vector<8x1024xf32>
    %36 = arith.truncf %35 : vector<8x1024xf32> to vector<8x1024xbf16>
    %c0_15 = arith.constant 0 : index
    %c0_16 = arith.constant 0 : index
    %37 = vector.load %arg3[%c0_15, %c0_16] : memref<1024x256xbf16, #tpu.memory_space<vmem>>, vector<1024x256xbf16>
    %cst_17 = arith.constant dense<0.000000e+00> : vector<8x256xf32>
    %38 = tpu.matmul %36, %37, %cst_17 {dimension_numbers = #tpu.dot_dimension_numbers<[1], [0], [0], [1], [0, 0, 1, 1], [], []>} : vector<8x1024xbf16>, vector<1024x256xbf16>, vector<8x256xf32> -> vector<8x256xf32>
    %c0_18 = arith.constant 0 : index
    %c0_19 = arith.constant 0 : index
    %39 = vector.load %arg4[%c0_18, %c0_19] : memref<1x256xf32, #tpu.memory_space<vmem>>, vector<1x256xf32>
    %40 = vector.broadcast %39 : vector<1x256xf32> to vector<8x256xf32>
    %41 = arith.addf %38, %40 : vector<8x256xf32>
    %c0_20 = arith.constant 0 : index
    %c0_21 = arith.constant 0 : index
    %42 = vector.load %arg5[%c0_20, %c0_21] : memref<8x256xf32, #tpu.memory_space<vmem>>, vector<8x256xf32>
    tpu.vector_store %arg5[%c0_20, %c0_21], %41 {strides = array<i32>} : memref<8x256xf32, #tpu.memory_space<vmem>>, vector<8x256xf32>,
    return
  }
}

</mosaic_0001>

<bundles_post_ra>
// kernel: tpu_custom_call.1
= control target key start
LH: loop header
LB: loop body
LE: loop exit
PB: predicated region body
PF: predicated region fallthrough
CT: control target
= control target key end

     0   :  { %10 = vsyncpa [#allocation3], 0  ;;  %s2089_s0 = inlined_call_operand.hbm [shape: f32[3,8,256], index: 0, kind: input, shape index: {}]   ;;  %s2090_s1 = inlined_call_operand.hbm [shape: f32[3,1024], index: 1, kind: input, shape index: {}]   ;;  %s2091_s2 = inlined_call_operand.hbm [shape: f32[1,1024], index: 2, kind: input, shape index: {}]   ;;  %s2092_s3 = inlined_call_operand.hbm [shape: bf16[1024,256], index: 3, kind: input, shape index: {}]   ;;  %s2093_s4 = inlined_call_operand.vmem [shape: f32[1,256], index: 4, kind: input, shape index: {}]   ;;  %s2094_s5 = inlined_call_operand.hbm [shape: f32[8,256], index: 5, kind: output, shape index: {}]  }
   0x1   :  { %11 = vsyncpa [#allocation6], 0 }
   0x2   :  { %12 = vsyncpa [#allocation9], 0 }
   0x3   :  { %13 = vsyncpa [#allocation4], 0  ;;  %s1837_s18 = smov [#allocation5]   ;;  %s1838_s20 = smov [#allocation2]  }
   0x4   :  { %s32_s19 = sshll.u32 %s1837_s18, 4  ;;  %s19_s21 = sshll.u32 %s1838_s20, 4  ;;  %s33_s19 = int_to_ptr.vmem [resolvable:$true] %s32_s19  ;;  %s1876_s21 = int_to_ptr.vmem [resolvable:$true] %s19_s21 }
   0x5   :  { %s1719_s24 = scalar_lea.hbm %s2090_s1, 512 }
   0x6   :  { %p1720_p0 = scmp.ne.s32.totalorder %s2090_s1, %s1719_s24  ;;  %p1723_p1 = scmp.lt.u32.totalorder %s1719_s24, %s2090_s1 }
   0x8   :  { %p1725_p2 = pnand %p1723_p1, %p1720_p0 }
   0xa   :  { %1728 = shalt.err (!%p1725_p2)
}
   0xb   :  { %s1729_s29 = scalar_lea.vmem %s33_s19, 512  ;;  %p1734_p4 = scmp.lt.s32.totalorder %s33_s19, %s33_s19 }
   0xc   :  { %p1730_p3 = scmp.ne.s32.totalorder %s33_s19, %s1729_s29  ;;  %p1735_p5 = scmp.lt.s32.totalorder %s1729_s29, %s1729_s29 }
   0xe   :  { %p1736_p6 = por %p1735_p5, %p1734_p4 }
  0x10   :  { %p1737_p7 = pnand %p1736_p6, %p1730_p3 }
  0x12   :  { %1740 = shalt.err (!%p1737_p7)
}
  0x13   :  { %35 = dma.hbm_to_vmem [thread:$0]  %s2090_s1, 512, %s33_s19, [#allocation6]  }
  0x14   :  { %s1741_s9 = scalar_lea.hbm %s2089_s0, 768 }
  0x15   :  { %p1742_p8 = scmp.ne.s32.totalorder %s2089_s0, %s1741_s9  ;;  %p1745_p9 = scmp.lt.u32.totalorder %s1741_s9, %s2089_s0 }
  0x17   :  { %p1747_p10 = pnand %p1745_p9, %p1742_p8 }
  0x19   :  { %1750 = shalt.err (!%p1747_p10)
}
  0x1a   :  { %s1751_s14 = scalar_lea.vmem %s1876_s21, 768  ;;  %p1756_p12 = scmp.lt.s32.totalorder %s1876_s21, %s1876_s21 }
  0x1b   :  { %p1752_p11 = scmp.ne.s32.totalorder %s1876_s21, %s1751_s14  ;;  %p1757_p13 = scmp.lt.s32.totalorder %s1751_s14, %s1751_s14 }
  0x1d   :  { %p1758_p0 = por %p1757_p13, %p1756_p12 }
  0x1f   :  { %p1759_p1 = pnand %p1758_p0, %p1752_p11 }
  0x21   :  { %1762 = shalt.err (!%p1759_p1)
}
  0x22   :  { %s1839_s1 = smov 256   ;;  %s1840_s15 = smov 16  }
  0x23   :  { %25 = dma.hbm_to_vmem [thread:$0]  %s2089_s0, 768, %s1876_s21, [#allocation3], %s1839_s1, %s1839_s1, %s1840_s15  }
  0x24   :  { %s1841_s18 = smov [#allocation7]   ;;  %s1842_s20 = smov [#allocation8]  }
  0x25   :  { %s42_s19 = sshll.u32 %s1841_s18, 4  ;;  %s51_s22 = sshll.u32 %s1842_s20, 4  ;;  %s43_s19 = int_to_ptr.vmem [resolvable:$true] %s42_s19  ;;  %s1907_s22 = int_to_ptr.vmem [resolvable:$true] %s51_s22 }
  0x26   :  { %s1763_s25 = scalar_lea.hbm %s2091_s2, 128 }
  0x27   :  { %p1764_p2 = scmp.ne.s32.totalorder %s2091_s2, %s1763_s25  ;;  %p1767_p3 = scmp.lt.u32.totalorder %s1763_s25, %s2091_s2 }
  0x29   :  { %p1769_p4 = pnand %p1767_p3, %p1764_p2 }
  0x2b   :  { %1772 = shalt.err (!%p1769_p4)
}
  0x2c   :  { %s1773_s0 = scalar_lea.vmem %s43_s19, 128  ;;  %p1778_p6 = scmp.lt.s32.totalorder %s43_s19, %s43_s19 }
  0x2d   :  { %p1774_p5 = scmp.ne.s32.totalorder %s43_s19, %s1773_s0  ;;  %p1779_p7 = scmp.lt.s32.totalorder %s1773_s0, %s1773_s0 }
  0x2f   :  { %p1780_p8 = por %p1779_p7, %p1778_p6 }
  0x31   :  { %p1781_p9 = pnand %p1780_p8, %p1774_p5 }
  0x33   :  { %1784 = shalt.err (!%p1781_p9)
}
  0x34   :  { %45 = dma.hbm_to_vmem [thread:$0]  %s2091_s2, 128, %s43_s19, [#allocation6]  }
  0x35   :  { %s1785_s8 = scalar_lea.hbm %s2092_s3, 16384 }
  0x36   :  { %p1786_p10 = scmp.ne.s32.totalorder %s2092_s3, %s1785_s8  ;;  %p1789_p11 = scmp.lt.u32.totalorder %s1785_s8, %s2092_s3 }
  0x38   :  { %p1791_p12 = pnand %p1789_p11, %p1786_p10 }
  0x3a   :  { %1794 = shalt.err (!%p1791_p12)
}
  0x3b   :  { %s1795_s13 = scalar_lea.vmem %s1907_s22, 16384  ;;  %p1800_p0 = scmp.lt.s32.totalorder %s1907_s22, %s1907_s22 }
  0x3c   :  { %p1796_p13 = scmp.ne.s32.totalorder %s1907_s22, %s1795_s13  ;;  %p1801_p1 = scmp.lt.s32.totalorder %s1795_s13, %s1795_s13 }
  0x3e   :  { %p1802_p2 = por %p1801_p1, %p1800_p0 }
  0x40   :  { %p1803_p3 = pnand %p1802_p2, %p1796_p13 }
  0x42   :  { %1806 = shalt.err (!%p1803_p3)
}
  0x43   :  { %s1843_s2 = smov 128   ;;  %s1844_s14 = smov 8  }
  0x44   :  { %57 = dma.hbm_to_vmem [thread:$0]  %s2092_s3, 16384, %s1907_s22, [#allocation9], %s1843_s2, %s1843_s2, %s1844_s14  }
  0x45   :  { %1829 = dma.done.wait [#allocation3], 768  }
  0x46   :  { %1830 = vsyncadd [#allocation3], 4294966528 }
  0x47   :  { %1831 = dma.done.wait [#allocation6], 640  }
  0x48   :  { %1832 = vsyncadd [#allocation6], 4294966656 }
  0x49   :  { %1833 = dma.done.wait [#allocation9], 16384  }
  0x4a   :  { %1834 = vsyncadd [#allocation9], 4294950912  ;;  %v76_v0 = vld [vmem:[#allocation2] sm:$0xff]  ;;  %v77_v1 = vld [vmem:[#allocation2 + $0x8] sm:$0xff]  ;;  %v87_v59 = vlaneseq  ;;  %s1845_s17 = smov [#allocation10]  }
  0x4b   :  { %v168_v2 = vld [vmem:[#allocation2 + $0x10] sm:$0xff]  ;;  %v78_v3 = vadd.f32 %v77_v1, %v76_v0  ;;  %v169_v4 = vld [vmem:[#allocation2 + $0x18] sm:$0xff]  ;;  %v263_v5 = vld [vmem:[#allocation2 + $0x20] sm:$0xff]  ;;  %s1367_s18 = sshll.u32 %s1845_s17, 4  ;;  %s1368_s18 = int_to_ptr.vmem [resolvable:$true] %s1367_s18 }
  0x4c   :  { %v264_v6 = vld [vmem:[#allocation2 + $0x28] sm:$0xff]  ;;  %v1527_v8 = vld [vmem:[#allocation8 + $0x4] ss:$8 sps:$4 sm:$0xff]   ;;  %v170_v9 = vadd.f32 %v169_v4, %v168_v2  ;;  %v1531_v11 = vld [vmem:[#allocation8] ss:$8 sps:$4 sm:$0xff]   ;;  %v1938_v0 = vshrl.u32 %v87_v59, 7  ;;  %p1812_p5 = scmp.lt.s32.totalorder %s1368_s18, %s1368_s18 }
  0x4d   :  { %v265_v7 = vadd.f32 %v264_v6, %v263_v5  ;;  %79 = vadd.xlane.f32.xlu0 %v78_v3  ;;  %v1529_v10 = vld [vmem:[#allocation8 + $0x204] ss:$8 sps:$4 sm:$0xff]   ;;  %1195 = vmatprep.subr.bf16.mxu1 %v1527_v8  ;;  %v1532_v12 = vld [vmem:[#allocation8 + $0x200] ss:$8 sps:$4 sm:$0xff]   ;;  %v1533_v13 = vld [vmem:[#allocation8 + $0x14] ss:$8 sps:$4 sm:$0xff]  }
  0x4e   :  { %1277 = vmatprep.subr.bf16.mxu0 %v1529_v10  ;;  %1196 = vmatpush1.bf16.msra.mxu1 %v1531_v11  ;;  %v1535_v14 = vld [vmem:[#allocation8 + $0x214] ss:$8 sps:$4 sm:$0xff]   ;;  %v1537_v15 = vld [vmem:[#allocation8 + $0x10] ss:$8 sps:$4 sm:$0xff]   ;;  %v1539_v17 = vld [vmem:[#allocation8 + $0x24] ss:$8 sps:$4 sm:$0xff]  }
  0x4f   :  { %266 = vadd.xlane.f32.xlu1 %v265_v7  ;;  %1278 = vmatpush1.bf16.msra.mxu0 %v1532_v12  ;;  %v1538_v16 = vld [vmem:[#allocation8 + $0x210] ss:$8 sps:$4 sm:$0xff]   ;;  %v1541_v18 = vld [vmem:[#allocation8 + $0x224] ss:$8 sps:$4 sm:$0xff]   ;;  %v1543_v19 = vld [vmem:[#allocation8 + $0x20] ss:$8 sps:$4 sm:$0xff]  }
  0x50   :  { %1197 = vmatprep.subr.bf16.mxu1 %v1533_v13  ;;  %1279 = vmatprep.subr.bf16.mxu0 %v1535_v14  ;;  %v1544_v20 = vld [vmem:[#allocation8 + $0x220] ss:$8 sps:$4 sm:$0xff]   ;;  %v1545_v21 = vld [vmem:[#allocation8 + $0x34] ss:$8 sps:$4 sm:$0xff]   ;;  %v1549_v23 = vld [vmem:[#allocation8 + $0x30] ss:$8 sps:$4 sm:$0xff]  }
  0x51   :  { %171 = vadd.xlane.f32.xlu0 %v170_v9  ;;  %v1547_v22 = vld [vmem:[#allocation8 + $0x234] ss:$8 sps:$4 sm:$0xff]   ;;  %v1550_v24 = vld [vmem:[#allocation8 + $0x230] ss:$8 sps:$4 sm:$0xff]   ;;  %v1551_v25 = vld [vmem:[#allocation8 + $0x44] ss:$8 sps:$4 sm:$0xff]  }
  0x52   :  { %1198 = vmatpush1.bf16.msra.mxu1 %v1537_v15  ;;  %v1553_v26 = vld [vmem:[#allocation8 + $0x244] ss:$8 sps:$4 sm:$0xff]   ;;  %v1555_v27 = vld [vmem:[#allocation8 + $0x40] ss:$8 sps:$4 sm:$0xff]   ;;  %v1557_v29 = vld [vmem:[#allocation8 + $0x54] ss:$8 sps:$4 sm:$0xff]  }
  0x53   :  { %1280 = vmatpush1.bf16.msra.mxu0 %v1538_v16  ;;  %1199 = vmatprep.subr.bf16.mxu1 %v1539_v17  ;;  %v1556_v28 = vld [vmem:[#allocation8 + $0x240] ss:$8 sps:$4 sm:$0xff]   ;;  %v1559_v30 = vld [vmem:[#allocation8 + $0x254] ss:$8 sps:$4 sm:$0xff]   ;;  %v1561_v31 = vld [vmem:[#allocation8 + $0x50] ss:$8 sps:$4 sm:$0xff]  }
  0x54   :  { %1281 = vmatprep.subr.bf16.mxu0 %v1541_v18  ;;  %v1562_v32 = vld [vmem:[#allocation8 + $0x250] ss:$8 sps:$4 sm:$0xff]   ;;  %v1563_v33 = vld [vmem:[#allocation8 + $0x64] ss:$8 sps:$4 sm:$0xff]   ;;  %v1567_v35 = vld [vmem:[#allocation8 + $0x60] ss:$8 sps:$4 sm:$0xff]  }
  0x55   :  { %v1565_v34 = vld [vmem:[#allocation8 + $0x264] ss:$8 sps:$4 sm:$0xff]   ;;  %v1568_v36 = vld [vmem:[#allocation8 + $0x260] ss:$8 sps:$4 sm:$0xff]   ;;  %v1569_v37 = vld [vmem:[#allocation8 + $0x74] ss:$8 sps:$4 sm:$0xff]  }
  0x56   :  { %1200 = vmatpush1.bf16.msra.mxu1 %v1543_v19  ;;  %v1571_v38 = vld [vmem:[#allocation8 + $0x274] ss:$8 sps:$4 sm:$0xff]   ;;  %v1573_v39 = vld [vmem:[#allocation8 + $0x70] ss:$8 sps:$4 sm:$0xff]   ;;  %v1575_v41 = vld [vmem:[#allocation8 + $0x84] ss:$8 sps:$4 sm:$0xff]  }
  0x57   :  { %1282 = vmatpush1.bf16.msra.mxu0 %v1544_v20  ;;  %1201 = vmatprep.subr.bf16.mxu1 %v1545_v21  ;;  %v1574_v40 = vld [vmem:[#allocation8 + $0x270] ss:$8 sps:$4 sm:$0xff]   ;;  %v1577_v42 = vld [vmem:[#allocation8 + $0x284] ss:$8 sps:$4 sm:$0xff]   ;;  %v1579_v43 = vld [vmem:[#allocation8 + $0x80] ss:$8 sps:$4 sm:$0xff]  }
  0x58   :  { %1283 = vmatprep.subr.bf16.mxu0 %v1547_v22  ;;  %v1580_v44 = vld [vmem:[#allocation8 + $0x280] ss:$8 sps:$4 sm:$0xff]   ;;  %v1581_v45 = vld [vmem:[#allocation8 + $0x94] ss:$8 sps:$4 sm:$0xff]   ;;  %v1585_v47 = vld [vmem:[#allocation8 + $0x90] ss:$8 sps:$4 sm:$0xff]  }
  0x59   :  { %v1583_v46 = vld [vmem:[#allocation8 + $0x294] ss:$8 sps:$4 sm:$0xff]   ;;  %v1586_v48 = vld [vmem:[#allocation8 + $0x290] ss:$8 sps:$4 sm:$0xff]   ;;  %v1587_v49 = vld [vmem:[#allocation8 + $0xa4] ss:$8 sps:$4 sm:$0xff]  }
  0x5a   :  { %1202 = vmatpush1.bf16.msra.mxu1 %v1549_v23  ;;  %v1589_v50 = vld [vmem:[#allocation8 + $0x2a4] ss:$8 sps:$4 sm:$0xff]   ;;  %v1591_v51 = vld [vmem:[#allocation8 + $0xa0] ss:$8 sps:$4 sm:$0xff]   ;;  %v1593_v53 = vld [vmem:[#allocation8 + $0xb4] ss:$8 sps:$4 sm:$0xff]  }
  0x5b   :  { %1284 = vmatpush1.bf16.msra.mxu0 %v1550_v24  ;;  %1203 = vmatprep.subr.bf16.mxu1 %v1551_v25  ;;  %v1592_v52 = vld [vmem:[#allocation8 + $0x2a0] ss:$8 sps:$4 sm:$0xff]   ;;  %v1595_v54 = vld [vmem:[#allocation8 + $0x2b4] ss:$8 sps:$4 sm:$0xff]   ;;  %v1597_v55 = vld [vmem:[#allocation8 + $0xb0] ss:$8 sps:$4 sm:$0xff]  }
  0x5c   :  { %1285 = vmatprep.subr.bf16.mxu0 %v1553_v26  ;;  %v1598_v56 = vld [vmem:[#allocation8 + $0x2b0] ss:$8 sps:$4 sm:$0xff]   ;;  %v1599_v57 = vld [vmem:[#allocation8 + $0xc4] ss:$8 sps:$4 sm:$0xff]   ;;  %v1603_v60 = vld [vmem:[#allocation8 + $0xc0] ss:$8 sps:$4 sm:$0xff]  }
  0x5d   :  { %v1601_v58 = vld [vmem:[#allocation8 + $0x2c4] ss:$8 sps:$4 sm:$0xff]   ;;  %v1604_v61 = vld [vmem:[#allocation8 + $0x2c0] ss:$8 sps:$4 sm:$0xff]   ;;  %v1605_v62 = vld [vmem:[#allocation8 + $0xd4] ss:$8 sps:$4 sm:$0xff]  }
  0x5e   :  { %1204 = vmatpush1.bf16.msra.mxu1 %v1555_v27  ;;  %v1607_v63 = vld [vmem:[#allocation8 + $0x2d4] ss:$8 sps:$4 sm:$0xff]   ;;  %v1609_v1 = vld [vmem:[#allocation8 + $0xd0] ss:$8 sps:$4 sm:$0xff]   ;;  %v1941_v3 = vsub.s32 2, %v1938_v0  ;;  %v1952_v13 = vsub.s32 6, %v1938_v0 }
  0x5f   :  { %1286 = vmatpush1.bf16.msra.mxu0 %v1556_v28  ;;  %1205 = vmatprep.subr.bf16.mxu1 %v1557_v29  ;;  %v1610_v2 = vld [vmem:[#allocation8 + $0x2d0] ss:$8 sps:$4 sm:$0xff]   ;;  %v1611_v5 = vld [vmem:[#allocation8 + $0xe4] ss:$8 sps:$4 sm:$0xff]   ;;  %v1615_v7 = vld [vmem:[#allocation8 + $0xe0] ss:$8 sps:$4 sm:$0xff]  }
  0x60   :  { %1287 = vmatprep.subr.bf16.mxu0 %v1559_v30  ;;  %v1943_v4 = vld [vmem:[#allocation7] sm:$0xff]  ;;  %v1613_v6 = vld [vmem:[#allocation8 + $0x2e4] ss:$8 sps:$4 sm:$0xff]   ;;  %v1616_v9 = vld [vmem:[#allocation8 + $0x2e0] ss:$8 sps:$4 sm:$0xff]   ;;  %v1967_v24 = vsub.s32 4, %v1938_v0 }
  0x61   :  { %v1945_v8 = vld [vmem:[#allocation5 + $0x8] sm:$0x77]  ;;  %v370_v11 = vrot.slane %v1943_v4, %v1941_v3  ;;  %v1617_v12 = vld [vmem:[#allocation8 + $0xf4] ss:$8 sps:$4 sm:$0xff]   ;;  %v386_v18 = vrot.slane %v1943_v4, %v1952_v13  ;;  %v1621_v19 = vld [vmem:[#allocation8 + $0xf0] ss:$8 sps:$4 sm:$0xff]  }
  0x62   :  { %1206 = vmatpush1.bf16.msra.mxu1 %v1561_v31  ;;  %v280_v10 = vrot.slane %v1945_v8, %v1941_v3  ;;  %v1619_v14 = vld [vmem:[#allocation8 + $0x2f4] ss:$8 sps:$4 sm:$0xff]   ;;  %v1622_v20 = vld [vmem:[#allocation8 + $0x2f0] ss:$8 sps:$4 sm:$0xff]   ;;  %v1625_v22 = vld [vmem:[#allocation8 + $0x104] ss:$8 sps:$4 sm:$0xff]  }
  0x63   :  { %1288 = vmatpush1.bf16.msra.mxu0 %v1562_v32  ;;  %1207 = vmatprep.subr.bf16.mxu1 %v1563_v33  ;;  %v1954_v15 = vld [vmem:[#allocation5 + $0x18] sm:$0x77]  ;;  %v1628_v23 = vld [vmem:[#allocation8 + $0x304] ss:$8 sps:$4 sm:$0xff]   ;;  %v72_v25 = vld [vmem:[#allocation5] sm:$0x77] }
  0x64   :  { %1289 = vmatprep.subr.bf16.mxu0 %v1565_v34  ;;  %v1957_v16 = vrot.slane %v280_v10, %v1941_v3  ;;  %v296_v17 = vrot.slane %v1954_v15, %v1941_v3  ;;  %v1970_v26 = vsub.s32 0, %v1938_v0  ;;  %v1973_v27 = vsub.s32 5, %v1938_v0  ;;  %v74_v29 = vld [vmem:[#allocation5 + $0x10] sm:$0x77] }
  0x65   :  { %v1976_v28 = vsub.s32 1, %v1938_v0  ;;  %v94_v30 = vrot.slane %v72_v25, %v1967_v24  ;;  %v276_v32 = vrot.slane %v72_v25, %v1952_v13  ;;  %v110_v34 = vrot.slane %v74_v29, %v1967_v24 }
  0x66   :  { %1208 = vmatpush1.bf16.msra.mxu1 %v1567_v35  ;;  %v1964_v21 = vrot.slane %v296_v17, %v1941_v3  ;;  %v181_v31 = vrot.slane %v72_v25, %v1973_v27  ;;  %v90_v33 = vrot.slane %v72_v25, %v1970_v26  ;;  %v197_v35 = vrot.slane %v74_v29, %v1973_v27 }
  0x67   :  { %1290 = vmatpush1.bf16.msra.mxu0 %v1568_v36  ;;  %1209 = vmatprep.subr.bf16.mxu1 %v1569_v37  ;;  %v177_v36 = vrot.slane %v72_v25, %v1976_v28  ;;  %v292_v37 = vrot.slane %v74_v29, %v1952_v13  ;;  %v118_v59 = vrot.slane %v1954_v15, %v1967_v24 }
  0x68   :  { %1291 = vmatprep.subr.bf16.mxu0 %v1571_v38  ;;  %v373_v38 = vsub.s32 3, %v1938_v0 }
  0x6a   :  { %1210 = vmatpush1.bf16.msra.mxu1 %v1573_v39  ;;  %v389_v39 = vsub.s32 7, %v1938_v0  ;;  %v378_v0 = vrot.slane %v1943_v4, %v1967_v24  ;;  %v374_v10 = vrot.slane %v1943_v4, %v373_v38 }
  0x6b   :  { %1292 = vmatpush1.bf16.msra.mxu0 %v1574_v40  ;;  %1211 = vmatprep.subr.bf16.mxu1 %v1575_v41  ;;  %v134_v40 = vrot.slane %v94_v30, %v1970_v26  ;;  %v366_v41 = vrot.slane %v1943_v4, %v1976_v28 }
  0x6c   :  { %1293 = vmatprep.subr.bf16.mxu0 %v1577_v42  ;;  %v382_v42 = vrot.slane %v1943_v4, %v1973_v27 }
  0x6e   :  { %1212 = vmatpush1.bf16.msra.mxu1 %v1579_v43  ;;  %v272_v43 = vrot.slane %v72_v25, %v1941_v3 }
  0x6f   :  { %1294 = vmatpush1.bf16.msra.mxu0 %v1580_v44  ;;  %1213 = vmatprep.subr.bf16.mxu1 %v1581_v45  ;;  %v221_v44 = vrot.slane %v181_v31, %v1976_v28  ;;  %v316_v45 = vrot.slane %v276_v32, %v1941_v3 }
  0x70   :  { %1295 = vmatprep.subr.bf16.mxu0 %v1583_v46  ;;  %v130_v46 = vrot.slane %v90_v33, %v1970_v26 }
  0x72   :  { %1214 = vmatpush1.bf16.msra.mxu1 %v1585_v47  ;;  %v106_v47 = vrot.slane %v74_v29, %v1970_v26 }
  0x73   :  { %1296 = vmatpush1.bf16.msra.mxu0 %v1586_v48  ;;  %1215 = vmatprep.subr.bf16.mxu1 %v1587_v49  ;;  %v150_v48 = vrot.slane %v110_v34, %v1970_v26  ;;  %v237_v49 = vrot.slane %v197_v35, %v1976_v28 }
  0x74   :  { %1297 = vmatprep.subr.bf16.mxu0 %v1589_v50  ;;  %v217_v50 = vrot.slane %v177_v36, %v1976_v28 }
  0x76   :  { %1216 = vmatpush1.bf16.msra.mxu1 %v1591_v51  ;;  %v362_v51 = vrot.slane %v1943_v4, %v1970_v26 }
  0x77   :  { %1298 = vmatpush1.bf16.msra.mxu0 %v1592_v52  ;;  %1217 = vmatprep.subr.bf16.mxu1 %v1593_v53  ;;  %v332_v52 = vrot.slane %v292_v37, %v1941_v3  ;;  %v193_v53 = vrot.slane %v74_v29, %v1976_v28 }
  0x78   :  { %1299 = vmatprep.subr.bf16.mxu0 %v1595_v54  ;;  %v288_v54 = vrot.slane %v74_v29, %v1941_v3 }
  0x7a   :  { %1218 = vmatpush1.bf16.msra.mxu1 %v1597_v55  ;;  %v102_v55 = vrot.slane %v1945_v8, %v1967_v24  ;;  %v1631_v24 = vld [vmem:[#allocation8 + $0x114] ss:$8 sps:$4 sm:$0xff]  }
  0x7b   :  { %1300 = vmatpush1.bf16.msra.mxu0 %v1598_v56  ;;  %1219 = vmatprep.subr.bf16.mxu1 %v1599_v57  ;;  %v312_v56 = vrot.slane %v272_v43, %v1941_v3  ;;  %v189_v57 = vrot.slane %v1945_v8, %v1973_v27 }
  0x7c   :  { %1301 = vmatprep.subr.bf16.mxu0 %v1601_v58  ;;  %v284_v58 = vrot.slane %v1945_v8, %v1952_v13 }
  0x7e   :  { %1220 = vmatpush1.bf16.msra.mxu1 %v1603_v60  ;;  %v146_v60 = vrot.slane %v106_v47, %v1970_v26  ;;  %v324_v17 = vrot.slane %v284_v58, %v1941_v3 }
  0x7f   :  { %1302 = vmatpush1.bf16.msra.mxu0 %v1604_v61  ;;  %1221 = vmatprep.subr.bf16.mxu1 %v1605_v62  ;;  %v205_v61 = vrot.slane %v1954_v15, %v1973_v27  ;;  %v300_v62 = vrot.slane %v1954_v15, %v1952_v13  ;;  %v1638_v13 = vld [vmem:[#allocation8 + $0x320] ss:$8 sps:$4 sm:$0xff]  }
  0x80   :  { %1303 = vmatprep.subr.bf16.mxu0 %v1607_v63  ;;  %v98_v63 = vrot.slane %v1945_v8, %v1970_v26 }
  0x82   :  { %1222 = vmatpush1.bf16.msra.mxu1 %v1609_v1  ;;  %v185_v1 = vrot.slane %v1945_v8, %v1976_v28  ;;  %v158_v8 = vrot.slane %v118_v59, %v1970_v26  ;;  %v138_v25 = vrot.slane %v98_v63, %v1970_v26 }
  0x83   :  { %1304 = vmatpush1.bf16.msra.mxu0 %v1610_v2  ;;  %1223 = vmatprep.subr.bf16.mxu1 %v1611_v5  ;;  %v114_v2 = vrot.slane %v1954_v15, %v1970_v26  ;;  %v201_v5 = vrot.slane %v1954_v15, %v1976_v28  ;;  %v245_v15 = vrot.slane %v205_v61, %v1976_v28 }
  0x84   :  { %1305 = vmatprep.subr.bf16.mxu0 %v1613_v6  ;;  %v233_v6 = vrot.slane %v193_v53, %v1976_v28  ;;  %v225_v30 = vrot.slane %v185_v1, %v1976_v28 }
  0x85   :  { %v154_v31 = vrot.slane %v114_v2, %v1970_v26  ;;  %v241_v32 = vrot.slane %v201_v5, %v1976_v28 }
  0x86   :  { %1224 = vmatpush1.bf16.msra.mxu1 %v1615_v7  ;;  %v328_v7 = vrot.slane %v288_v54, %v1941_v3 }
  0x87   :  { %1306 = vmatpush1.bf16.msra.mxu0 %v1616_v9  ;;  %1225 = vmatprep.subr.bf16.mxu1 %v1617_v12  ;;  %v142_v9 = vrot.slane %v102_v55, %v1970_v26 }
  0x88   :  { %1307 = vmatprep.subr.bf16.mxu0 %v1619_v14  ;;  %v229_v14 = vrot.slane %v189_v57, %v1976_v28 }
  0x8a   :  { %1226 = vmatpush1.bf16.msra.mxu1 %v1621_v19  ;;  %v390_v19 = vrot.slane %v1943_v4, %v389_v39  ;;  %v1635_v4 = vld [vmem:[#allocation8 + $0x120] ss:$8 sps:$4 sm:$0xff]  }
  0x8b   :  { %1308 = vmatpush1.bf16.msra.mxu0 %v1622_v20  ;;  %1236 = vmatprep.subr.bf16.mxu1 %v1625_v22 }
  0x8c   :  { %1318 = vmatprep.subr.bf16.mxu0 %v1628_v23  ;;  %v340_v23 = vrot.slane %v300_v62, %v1941_v3 }
  0xda   :  { %v80_v12 = vpop.xlane.xlu0 %79 }
  0xdb   :  { %v82_v20 = vmul.f32 0.00390625, %v80_v12 }
  0xdc   :  { %v267_v22 = vpop.xlane.xlu1 %266 }
  0xdd   :  { %v268_v29 = vmul.f32 0.00390625, %v267_v22  ;;  %v160_v33 = vmul.f32 %v134_v40, %v82_v20  ;;  %v164_v34 = vmul.f32 %v150_v48, %v82_v20  ;;  %v159_v35 = vmul.f32 %v130_v46, %v82_v20 }
  0xde   :  { %v163_v36 = vmul.f32 %v146_v60, %v82_v20  ;;  %v172_v37 = vpop.xlane.xlu0 %171  ;;  %v162_v54 = vmul.f32 %v142_v9, %v82_v20  ;;  %v166_v57 = vmul.f32 %v158_v8, %v82_v20  ;;  %v161_v59 = vmul.f32 %v138_v25, %v82_v20 }
  0xdf   :  { %v342_v38 = vmul.f32 %v316_v45, %v268_v29  ;;  %v346_v39 = vmul.f32 %v332_v52, %v268_v29  ;;  %v341_v43 = vmul.f32 %v312_v56, %v268_v29  ;;  %v345_v47 = vmul.f32 %v328_v7, %v268_v29 }
  0xe0   :  { %v173_v53 = vmul.f32 0.00390625, %v172_v37  ;;  %v344_v55 = vmul.f32 %v324_v17, %v268_v29  ;;  %v348_v58 = vmul.f32 %v340_v23, %v268_v29  ;;  %v343_v61 = vmul.f32 %v1957_v16, %v268_v29  ;;  %v1640_v37 = vld [vmem:[#allocation8 + $0x324] ss:$8 sps:$4 sm:$0xff]  }
  0xe1   :  { %v165_v62 = vmul.f32 %v154_v31, %v82_v20 }
  0xe2   :  { %v247_v63 = vmul.f32 %v221_v44, %v173_v53  ;;  %v251_v1 = vmul.f32 %v237_v49, %v173_v53  ;;  %v246_v40 = vmul.f32 %v217_v50, %v173_v53  ;;  %v250_v48 = vmul.f32 %v233_v6, %v173_v53 }
  0xe3   :  { %v249_v46 = vmul.f32 %v229_v14, %v173_v53  ;;  %v253_v60 = vmul.f32 %v245_v15, %v173_v53  ;;  %v248_v2 = vmul.f32 %v225_v30, %v173_v53  ;;  %v252_v45 = vmul.f32 %v241_v32, %v173_v53  ;;  %v1652_v53 = vld [vmem:[#allocation8 + $0x344] ss:$8 sps:$4 sm:$0xff]  }
  0xe4   :  { %v255_v52 = vadd.f32 %v247_v63, %v160_v33  ;;  %v259_v56 = vadd.f32 %v251_v1, %v164_v34  ;;  %v254_v5 = vadd.f32 %v246_v40, %v159_v35  ;;  %v258_v7 = vadd.f32 %v250_v48, %v163_v36  ;;  %v1623_v33 = vld [vmem:[#allocation8 + $0x100] ss:$8 sps:$4 sm:$0xff]   ;;  %v1637_v36 = vld [vmem:[#allocation8 + $0x124] ss:$8 sps:$4 sm:$0xff]   ;;  %v1667_v48 = vld [vmem:[#allocation8 + $0x174] ss:$8 sps:$4 sm:$0xff]  }
  0xe5   :  { %v257_v9 = vadd.f32 %v249_v46, %v162_v54  ;;  %v261_v12 = vadd.f32 %v253_v60, %v166_v57  ;;  %v256_v17 = vadd.f32 %v248_v2, %v161_v59  ;;  %v260_v8 = vadd.f32 %v252_v45, %v165_v62  ;;  %v1647_v54 = vld [vmem:[#allocation8 + $0x140] ss:$8 sps:$4 sm:$0xff]   ;;  %v1655_v57 = vld [vmem:[#allocation8 + $0x154] ss:$8 sps:$4 sm:$0xff]   ;;  %v1653_v59 = vld [vmem:[#allocation8 + $0x150] ss:$8 sps:$4 sm:$0xff]  }
  0xe6   :  { %v350_v22 = vadd.f32 %v342_v38, %v255_v52  ;;  %v354_v23 = vadd.f32 %v346_v39, %v259_v56  ;;  %v349_v16 = vadd.f32 %v341_v43, %v254_v5  ;;  %v353_v20 = vadd.f32 %v345_v47, %v258_v7  ;;  %v1646_v38 = vld [vmem:[#allocation8 + $0x334] ss:$8 sps:$4 sm:$0xff]   ;;  %v1641_v39 = vld [vmem:[#allocation8 + $0x130] ss:$8 sps:$4 sm:$0xff]   ;;  %v1649_v47 = vld [vmem:[#allocation8 + $0x144] ss:$8 sps:$4 sm:$0xff]  }
  0xe7   :  { %v352_v44 = vadd.f32 %v344_v55, %v257_v9  ;;  %v356_v49 = vadd.f32 %v348_v58, %v261_v12  ;;  %v351_v50 = vadd.f32 %v343_v61, %v256_v17  ;;  %v347_v6 = vmul.f32 %v1964_v21, %v268_v29  ;;  %v1644_v43 = vld [vmem:[#allocation8 + $0x330] ss:$8 sps:$4 sm:$0xff]   ;;  %v1650_v55 = vld [vmem:[#allocation8 + $0x340] ss:$8 sps:$4 sm:$0xff]   ;;  %v1658_v58 = vld [vmem:[#allocation8 + $0x354] ss:$8 sps:$4 sm:$0xff]  }
  0xe8   :  { %v400_v14 = vadd.f32 %v366_v41, %v350_v22  ;;  %v404_v15 = vadd.f32 %v382_v42, %v354_v23  ;;  %v399_v25 = vadd.f32 %v362_v51, %v349_v16  ;;  %v403_v30 = vadd.f32 %v378_v0, %v353_v20  ;;  %v1626_v42 = vld [vmem:[#allocation8 + $0x300] ss:$8 sps:$4 sm:$0xff]   ;;  %v1634_v0 = vld [vmem:[#allocation8 + $0x314] ss:$8 sps:$4 sm:$0xff]   ;;  %v1656_v61 = vld [vmem:[#allocation8 + $0x350] ss:$8 sps:$4 sm:$0xff]  }
  0xe9   :  { %v402_v31 = vadd.f32 %v374_v10, %v352_v44  ;;  %v406_v32 = vadd.f32 %v390_v19, %v356_v49  ;;  %v2061_v21 = vadd.f32 %v370_v11, %v351_v50  ;;  %v355_v41 = vadd.f32 %v347_v6, %v260_v8  ;;  %v1629_v10 = vld [vmem:[#allocation8 + $0x110] ss:$8 sps:$4 sm:$0xff]   ;;  %v1661_v62 = vld [vmem:[#allocation8 + $0x164] ss:$8 sps:$4 sm:$0xff]   ;;  %v1659_v1 = vld [vmem:[#allocation8 + $0x160] ss:$8 sps:$4 sm:$0xff]  }
  0xea   :  { %v408_v29 = vpack.c.bf16 %v400_v14, %v400_v14  ;;  %v412_v27 = vpack.c.bf16 %v404_v15, %v404_v15  ;;  %v407_v34 = vpack.c.bf16 %v399_v25, %v399_v25  ;;  %v411_v35 = vpack.c.bf16 %v403_v30, %v403_v30  ;;  %v1632_v19 = vld [vmem:[#allocation8 + $0x310] ss:$8 sps:$4 sm:$0xff]   ;;  %v1664_v63 = vld [vmem:[#allocation8 + $0x364] ss:$8 sps:$4 sm:$0xff]   ;;  %v1662_v40 = vld [vmem:[#allocation8 + $0x360] ss:$8 sps:$4 sm:$0xff]  }
  0xeb   :  { %v2066_v51 = vadd.f32 %v386_v18, %v355_v41  ;;  %v410_v3 = vpack.c.bf16 %v402_v31, %v402_v31  ;;  %v414_v11 = vpack.c.bf16 %v406_v32, %v406_v32  ;;  %v1643_v18 = vld [vmem:[#allocation8 + $0x134] ss:$8 sps:$4 sm:$0xff]   ;;  %v1665_v60 = vld [vmem:[#allocation8 + $0x170] ss:$8 sps:$4 sm:$0xff]   ;;  %v1673_v45 = vld [vmem:[#allocation8 + $0x184] ss:$8 sps:$4 sm:$0xff]  }
  0xec   :  { %1227 = vmatprep.mubr.bf16.mxu1 %v408_v29  ;;  %1309 = vmatprep.mubr.bf16.mxu0 %v412_v27  ;;  %v1670_v46 = vld [vmem:[#allocation8 + $0x374] ss:$8 sps:$4 sm:$0xff]   ;;  %v1668_v2 = vld [vmem:[#allocation8 + $0x370] ss:$8 sps:$4 sm:$0xff]   ;;  %v1676_v52 = vld [vmem:[#allocation8 + $0x384] ss:$8 sps:$4 sm:$0xff]  }
  0xed   :  { %1228 = vmatmul.mubr.bf16.vlgmr.msra.gmra.mrb[0].mxu1 %v407_v34  ;;  %1310 = vmatmul.mubr.bf16.vlgmr.msra.gmra.mrb[0].mxu0 %v411_v35  ;;  %v1671_v56 = vld [vmem:[#allocation8 + $0x180] ss:$8 sps:$4 sm:$0xff]   ;;  %v1679_v7 = vld [vmem:[#allocation8 + $0x194] ss:$8 sps:$4 sm:$0xff]   ;;  %v1677_v12 = vld [vmem:[#allocation8 + $0x190] ss:$8 sps:$4 sm:$0xff]  }
  0xee   :  { %1237 = vmatpush1.bf16.msra.mxu1 %v1623_v33  ;;  %1319 = vmatpush1.bf16.msra.mxu0 %v1626_v42  ;;  %v1674_v5 = vld [vmem:[#allocation8 + $0x380] ss:$8 sps:$4 sm:$0xff]   ;;  %v1682_v9 = vld [vmem:[#allocation8 + $0x394] ss:$8 sps:$4 sm:$0xff]   ;;  %v1680_v17 = vld [vmem:[#allocation8 + $0x390] ss:$8 sps:$4 sm:$0xff]  }
  0xef   :  { %1268 = vmatprep.mubr.bf16.mxu1 %v410_v3  ;;  %1350 = vmatprep.mubr.bf16.mxu0 %v414_v11  ;;  %v1685_v8 = vld [vmem:[#allocation8 + $0x1a4] ss:$8 sps:$4 sm:$0xff]   ;;  %v1683_v23 = vld [vmem:[#allocation8 + $0x1a0] ss:$8 sps:$4 sm:$0xff]   ;;  %v1691_v20 = vld [vmem:[#allocation8 + $0x1b4] ss:$8 sps:$4 sm:$0xff]   ;;  %v409_v3 = vpack.c.bf16 %v2061_v21, %v2061_v21  ;;  %v413_v11 = vpack.c.bf16 %v2066_v51, %v2066_v51 }
  0xf0   :  { %1238 = vmatprep.subr.bf16.mxu1 %v1631_v24  ;;  %1320 = vmatprep.subr.bf16.mxu0 %v1634_v0  ;;  %v1688_v22 = vld [vmem:[#allocation8 + $0x3a4] ss:$8 sps:$4 sm:$0xff]   ;;  %v1686_v16 = vld [vmem:[#allocation8 + $0x3a0] ss:$8 sps:$4 sm:$0xff]   ;;  %v1694_v44 = vld [vmem:[#allocation8 + $0x3b4] ss:$8 sps:$4 sm:$0xff]  }
  0xf1   :  { %v1689_v49 = vld [vmem:[#allocation8 + $0x1b0] ss:$8 sps:$4 sm:$0xff]   ;;  %v1697_v6 = vld [vmem:[#allocation8 + $0x1c4] ss:$8 sps:$4 sm:$0xff]   ;;  %v1695_v15 = vld [vmem:[#allocation8 + $0x1c0] ss:$8 sps:$4 sm:$0xff]  }
  0xf2   :  { %1239 = vmatpush1.bf16.msra.mxu1 %v1629_v10  ;;  %1321 = vmatpush1.bf16.msra.mxu0 %v1632_v19  ;;  %v1692_v50 = vld [vmem:[#allocation8 + $0x3b0] ss:$8 sps:$4 sm:$0xff]   ;;  %v1700_v14 = vld [vmem:[#allocation8 + $0x3c4] ss:$8 sps:$4 sm:$0xff]   ;;  %v1698_v25 = vld [vmem:[#allocation8 + $0x3c0] ss:$8 sps:$4 sm:$0xff]  }
  0xf3   :  { %1240 = vmatprep.subr.bf16.mxu1 %v1637_v36  ;;  %1322 = vmatprep.subr.bf16.mxu0 %v1640_v37  ;;  %v1703_v30 = vld [vmem:[#allocation8 + $0x1d4] ss:$8 sps:$4 sm:$0xff]   ;;  %v1701_v32 = vld [vmem:[#allocation8 + $0x1d0] ss:$8 sps:$4 sm:$0xff]   ;;  %v1709_v29 = vld [vmem:[#allocation8 + $0x1e4] ss:$8 sps:$4 sm:$0xff]  }
  0xf4   :  { %v1706_v31 = vld [vmem:[#allocation8 + $0x3d4] ss:$8 sps:$4 sm:$0xff]   ;;  %v1704_v41 = vld [vmem:[#allocation8 + $0x3d0] ss:$8 sps:$4 sm:$0xff]   ;;  %v1712_v33 = vld [vmem:[#allocation8 + $0x3e4] ss:$8 sps:$4 sm:$0xff]  }
  0xf5   :  { %v1707_v27 = vld [vmem:[#allocation8 + $0x1e0] ss:$8 sps:$4 sm:$0xff]   ;;  %v1715_v34 = vld [vmem:[#allocation8 + $0x1f4] ss:$8 sps:$4 sm:$0xff]   ;;  %v1713_v24 = vld [vmem:[#allocation8 + $0x1f0] ss:$8 sps:$4 sm:$0xff]  }
  0xf6   :  { %1241 = vmatpush1.bf16.msra.mxu1 %v1635_v4  ;;  %1323 = vmatpush1.bf16.msra.mxu0 %v1638_v13  ;;  %v1710_v42 = vld [vmem:[#allocation8 + $0x3e0] ss:$8 sps:$4 sm:$0xff]   ;;  %v1718_v35 = vld [vmem:[#allocation8 + $0x3f4] ss:$8 sps:$4 sm:$0xff]   ;;  %v1716_v0 = vld [vmem:[#allocation8 + $0x3f0] ss:$8 sps:$4 sm:$0xff]  }
  0xf7   :  { %1242 = vmatprep.subr.bf16.mxu1 %v1643_v18  ;;  %1324 = vmatprep.subr.bf16.mxu0 %v1646_v38  ;;  %v543_v10 = vld [vmem:[%s2093_s4] sm:$0x3]  ;;  %s1807_s4 = scalar_lea.vmem %s1368_s18, 256 }
  0xf8   :  { %v548_v19 = vrot.slane %v543_v10, %v1970_v26  ;;  %v552_v36 = vrot.slane %v543_v10, %v1976_v28  ;;  %p1808_p4 = scmp.ne.s32.totalorder %s1368_s18, %s1807_s4  ;;  %p1813_p6 = scmp.lt.s32.totalorder %s1807_s4, %s1807_s4 }
  0xfa   :  { %1243 = vmatpush1.bf16.msra.mxu1 %v1641_v39  ;;  %1325 = vmatpush1.bf16.msra.mxu0 %v1644_v43  ;;  %p1814_p7 = por %p1813_p6, %p1812_p5 }
  0xfb   :  { %1244 = vmatprep.subr.bf16.mxu1 %v1649_v47  ;;  %1326 = vmatprep.subr.bf16.mxu0 %v1652_v53 }
  0xfc   :  { %p1815_p8 = pnand %p1814_p7, %p1808_p4 }
  0xfe   :  { %1245 = vmatpush1.bf16.msra.mxu1 %v1647_v54  ;;  %1327 = vmatpush1.bf16.msra.mxu0 %v1650_v55 }
  0xff   :  { %1246 = vmatprep.subr.bf16.mxu1 %v1655_v57  ;;  %1328 = vmatprep.subr.bf16.mxu0 %v1658_v58 }
 0x102   :  { %1247 = vmatpush1.bf16.msra.mxu1 %v1653_v59  ;;  %1329 = vmatpush1.bf16.msra.mxu0 %v1656_v61 }
 0x103   :  { %1248 = vmatprep.subr.bf16.mxu1 %v1661_v62  ;;  %1330 = vmatprep.subr.bf16.mxu0 %v1664_v63 }
 0x106   :  { %1249 = vmatpush1.bf16.msra.mxu1 %v1659_v1  ;;  %1331 = vmatpush1.bf16.msra.mxu0 %v1662_v40 }
 0x107   :  { %1250 = vmatprep.subr.bf16.mxu1 %v1667_v48  ;;  %1332 = vmatprep.subr.bf16.mxu0 %v1670_v46 }
 0x10a   :  { %1251 = vmatpush1.bf16.msra.mxu1 %v1665_v60  ;;  %1333 = vmatpush1.bf16.msra.mxu0 %v1668_v2 }
 0x10b   :  { %1252 = vmatprep.subr.bf16.mxu1 %v1673_v45  ;;  %1334 = vmatprep.subr.bf16.mxu0 %v1676_v52 }
 0x10e   :  { %1253 = vmatpush1.bf16.msra.mxu1 %v1671_v56  ;;  %1335 = vmatpush1.bf16.msra.mxu0 %v1674_v5 }
 0x10f   :  { %1254 = vmatprep.subr.bf16.mxu1 %v1679_v7  ;;  %1336 = vmatprep.subr.bf16.mxu0 %v1682_v9 }
 0x112   :  { %1255 = vmatpush1.bf16.msra.mxu1 %v1677_v12  ;;  %1337 = vmatpush1.bf16.msra.mxu0 %v1680_v17 }
 0x113   :  { %1256 = vmatprep.subr.bf16.mxu1 %v1685_v8  ;;  %1338 = vmatprep.subr.bf16.mxu0 %v1688_v22 }
 0x116   :  { %1257 = vmatpush1.bf16.msra.mxu1 %v1683_v23  ;;  %1339 = vmatpush1.bf16.msra.mxu0 %v1686_v16 }
 0x117   :  { %1258 = vmatprep.subr.bf16.mxu1 %v1691_v20  ;;  %1340 = vmatprep.subr.bf16.mxu0 %v1694_v44 }
 0x11a   :  { %1259 = vmatpush1.bf16.msra.mxu1 %v1689_v49  ;;  %1341 = vmatpush1.bf16.msra.mxu0 %v1692_v50 }
 0x11b   :  { %1260 = vmatprep.subr.bf16.mxu1 %v1697_v6  ;;  %1342 = vmatprep.subr.bf16.mxu0 %v1700_v14 }
 0x11e   :  { %1261 = vmatpush1.bf16.msra.mxu1 %v1695_v15  ;;  %1343 = vmatpush1.bf16.msra.mxu0 %v1698_v25 }
 0x11f   :  { %1262 = vmatprep.subr.bf16.mxu1 %v1703_v30  ;;  %1344 = vmatprep.subr.bf16.mxu0 %v1706_v31 }
 0x122   :  { %1263 = vmatpush1.bf16.msra.mxu1 %v1701_v32  ;;  %1345 = vmatpush1.bf16.msra.mxu0 %v1704_v41 }
 0x123   :  { %1264 = vmatprep.subr.bf16.mxu1 %v1709_v29  ;;  %1346 = vmatprep.subr.bf16.mxu0 %v1712_v33 }
 0x126   :  { %1265 = vmatpush1.bf16.msra.mxu1 %v1707_v27  ;;  %1347 = vmatpush1.bf16.msra.mxu0 %v1710_v42 }
 0x127   :  { %1266 = vmatprep.subr.bf16.mxu1 %v1715_v34  ;;  %1348 = vmatprep.subr.bf16.mxu0 %v1718_v35 }
 0x12a   :  { %1267 = vmatpush1.bf16.msra.mxu1 %v1713_v24  ;;  %1349 = vmatpush1.bf16.msra.mxu0 %v1716_v0 }
 0x12d   :  { %1269 = vmatmul.mubr.bf16.vlgmr.msra.gmra.mrb[0].mxu1 %v409_v3  ;;  %1351 = vmatmul.mubr.bf16.vlgmr.msra.gmra.mrb[0].mxu0 %v413_v11 }
 0x200   :  { %v1270_v37 = vpop.f32.mrb[0].mxu1  ;;  %v1352_v4 = vpop.f32.mrb[0].mxu0 }
 0x201   :  { %v1506_v13 = vadd.f32 %v1270_v37, %v548_v19  ;;  %v1272_v18 = vpop.f32.mrb[1].mxu1  ;;  %v1354_v38 = vpop.f32.mrb[1].mxu0 }
 0x202   :  { %v1508_v21 = vadd.f32 %v1272_v18, %v552_v36  ;;  %v1274_v39 = vpop.f32.mrb[2].mxu1  ;;  %v1356_v51 = vpop.f32.mrb[2].mxu0 }
 0x203   :  { %v1507_v43 = vadd.f32 %v1506_v13, %v1352_v4  ;;  %v1275_v47 = vpop.f32.mrb[3].mxu1  ;;  %v1357_v53 = vpop.f32.mrb[3].mxu0 }
 0x204   :  { %v1509_v54 = vadd.f32 %v1508_v21, %v1354_v38 }
 0x205   :  { %1359 = vst [vmem:[#allocation10] sm:$0xff] %v1507_v43 }
 0x206   :  { %1360 = vst [vmem:[#allocation10 + $0x8] sm:$0xff] %v1509_v54 }
 0x207   :  { %1818 = shalt.err (!%p1815_p8)
}
 0x208   :  { %s1819_s22 = scalar_lea.hbm %s2094_s5, 256 }
 0x209   :  { %p1820_p9 = scmp.ne.s32.totalorder %s2094_s5, %s1819_s22  ;;  %p1823_p10 = scmp.lt.u32.totalorder %s1819_s22, %s2094_s5 }
 0x20b   :  { %p1825_p11 = pnand %p1823_p10, %p1820_p9 }
 0x20d   :  { %1828 = shalt.err (!%p1825_p11)
}
 0x20e   :  { %1370 = dma.vmem_to_hbm [thread:$0]  %s1368_s18, 256, %s2094_s5, [#allocation4]  }
 0x20f   :  { %1835 = dma.done.wait [#allocation4], 256  }
 0x210   :  { %1836 = vsyncadd [#allocation4], 4294967040 }
 0x211   :  { %1374 = vsyncpa [#allocation3], 1 }
 0x212   :  { %1375 = vsyncpa [#allocation6], 1 }
 0x213   :  { %1376 = vsyncpa [#allocation9], 1 }
 0x214   :  { %1377 = vsyncpa [#allocation4], 1 }

</bundles_post_ra>
